<compile_context>
chip_gen: v7x
topology: tpu7x:2x2x1
jax: 0.10.0
libtpu: 0.0.40
codegen_flags: <defaults>
</compile_context>

<pallas_src>
import functools
import math

import jax
import jax.numpy as jnp
from jax.experimental import pallas as pl
from jax.experimental.pallas import tpu as pltpu


def _vmem_capacity_bytes():
    """Best-effort VMEM capacity query; conservative (v7x) fallback."""
    try:
        info = pltpu.get_tpu_info()
        cap = getattr(info, "vmem_capacity_bytes", None)
        if cap:
            return int(cap)
    except Exception:
        pass
    return 64 * 1024 * 1024


def _arc_margin_train_kernel(x_ref, wt_ref, invw_ref, invx_ref, t_ref,
                             out_ref, cos_ref, *,
                             s, cos_m, sin_m, th, mm, easy_margin):
    # MXU: (B, D) @ (D, TN) -> (B, TN), f32 accumulation. Normalization is a
    # cheap post-matmul scale with precomputed inverse norms.
    xw = jnp.dot(x_ref[...], wt_ref[...], preferred_element_type=jnp.float32)
    cosine = jnp.clip(xw * invx_ref[...] * invw_ref[...], -1.0, 1.0)
    cos_ref[...] = cosine.astype(cos_ref.dtype)

    sine = jnp.sqrt(jnp.maximum(1.0 - cosine * cosine, 0.0))
    phi = cosine * cos_m - sine * sin_m
    if easy_margin:
        phi = jnp.where(cosine > 0.0, phi, cosine)
    else:
        phi = jnp.where(cosine > th, phi, cosine - mm)

    # Select against the *global* class index of this C tile (replaces the
    # float one-hot blend of the PyTorch code).
    B, TN = cosine.shape
    col = jax.lax.broadcasted_iota(jnp.int32, (B, TN), dimension=1)
    col = col + pl.program_id(0) * TN
    out_ref[...] = jnp.where(col == t_ref[...], phi, cosine) * s


def _arc_margin_test_kernel(x_ref, wt_ref, invw_ref, invx_ref, cos_ref):
    xw = jnp.dot(x_ref[...], wt_ref[...], preferred_element_type=jnp.float32)
    cos_ref[...] = jnp.clip(xw * invx_ref[...] * invw_ref[...],
                            -1.0, 1.0).astype(cos_ref.dtype)


def arc_margin_forward(x, weight, target=None, *, s=64.0, m=0.5,
                       easy_margin=False, mode='train',
                       compute_dtype=jnp.bfloat16,
                       cosine_dtype=jnp.float32,
                       block_c=None):
    """JAX wrapper reproducing ArcMarginProduct.forward.

    Returns (output, cosine) in train mode; (None, cosine) in test mode.
    `weight` is (out_features, in_features) as in nn.Linear.
    """
    B, D = x.shape
    C, D2 = weight.shape
    assert D == D2
    train = (mode != 'test')

    w_bytes = jnp.dtype(compute_dtype).itemsize
    cos_bytes = jnp.dtype(cosine_dtype).itemsize
    vmem_cap = _vmem_capacity_bytes()

    # --- tile size over C ----------------------------------------------------
    if block_c is None:
        # Largest tile such that double-buffered W + inv_wn + output tiles fit
        # in ~40% of VMEM (leaves room for pipeline/internal scratch).
        budget = int(vmem_cap * 0.40)
        per_col = (2 * D * w_bytes          # W tile (double-buffered)
                   + 2 * 4                  # inv_wn tile
                   + 2 * B * 4              # f32 output tile
                   + (2 * B * cos_bytes if train else 0))
        block_c = max(128, budget // max(per_col, 1))
        block_c = min(block_c, 8192)
    tn = max(128, (min(block_c, max(C, 128)) // 128) * 128)
    n_tiles = pl.cdiv(C, tn)
    c_pad = n_tiles * tn
    grid = (n_tiles,)

    # --- one-time prep in the wrapper (plain XLA, fused) ----------------------
    x_c = x.astype(compute_dtype)                         # streamed once
    x_f = x_c.astype(jnp.float32)
    inv_xn = jax.lax.rsqrt(                               # (B, 1) f32
        jnp.maximum(jnp.sum(x_f * x_f, axis=-1, keepdims=True), 1e-24))

    w_c = weight.astype(compute_dtype)
    w_f = w_c.astype(jnp.float32)
    inv_wn = jax.lax.rsqrt(                               # (1, C) f32
        jnp.maximum(jnp.sum(w_f * w_f, axis=-1), 1e-24)).reshape(1, C)
    w_t = w_c.T                                           # (D, C) streamed W

    if c_pad != C:
        # Zero-pad to the tile boundary: padded classes get cosine == 0
        # (finite) and can never match a real target index.
        w_t = jnp.pad(w_t, ((0, 0), (0, c_pad - C)))
        inv_wn = jnp.pad(inv_wn, ((0, 0), (0, c_pad - C)))

    # --- VMEM limit derived from actual buffer footprint ----------------------
    vmem_est = (2 * D * tn * w_bytes            # double-buffered W tile
                + 2 * tn * 4                    # double-buffered inv_wn tile
                + 2 * B * D * w_bytes           # x (pinned)
                + 8 * B                         # inv_xn + target
                + 2 * B * tn * 4                # f32 output / cosine tile
                + (2 * B * tn * cos_bytes if train else 0))
    vmem_limit = int(vmem_est * 1.5) + (8 << 20)
    vmem_limit = max(16 << 20, min(vmem_limit, int(vmem_cap * 0.9)))

    compiler_params = pltpu.CompilerParams(
        dimension_semantics=("parallel",),      # shard C tiles across TCs (v7x)
        vmem_limit_bytes=vmem_limit,
    )

    x_spec = pl.BlockSpec((B, D), lambda j: (0, 0))       # pinned, fetched once
    w_spec = pl.BlockSpec((D, tn), lambda j: (0, j))      # streamed W tile
    invw_spec = pl.BlockSpec((1, tn), lambda j: (0, j))   # streamed 1/||w||
    invx_spec = pl.BlockSpec((B, 1), lambda j: (0, 0))    # tiny, constant
    o_spec = pl.BlockSpec((B, tn), lambda j: (0, j))

    if not train:
        cosine = pl.pallas_call(
            _arc_margin_test_kernel,
            out_shape=jax.ShapeDtypeStruct((B, c_pad), cosine_dtype),
            grid_spec=pltpu.PrefetchScalarGridSpec(
                num_scalar_prefetch=0, grid=grid,
                in_specs=[x_spec, w_spec, invw_spec, invx_spec],
                out_specs=o_spec),
            compiler_params=compiler_params,
        )(x_c, w_t, inv_wn, inv_xn)
        if c_pad != C:
            cosine = cosine[:, :C]
        return None, cosine

    cos_m = math.cos(m)
    sin_m = math.sin(m)
    th = math.cos(math.pi - m)
    mm = math.sin(math.pi - m) * m
    target2d = target.reshape(B, 1).astype(jnp.int32)
    t_spec = pl.BlockSpec((B, 1), lambda j: (0, 0))       # tiny, constant

    kernel = functools.partial(
        _arc_margin_train_kernel, s=float(s), cos_m=cos_m, sin_m=sin_m,
        th=th, mm=mm, easy_margin=bool(easy_margin))

    output, cosine = pl.pallas_call(
        kernel,
        out_shape=(jax.ShapeDtypeStruct((B, c_pad), jnp.float32),
                   jax.ShapeDtypeStruct((B, c_pad), cosine_dtype)),
        grid_spec=pltpu.PrefetchScalarGridSpec(
            num_scalar_prefetch=0, grid=grid,
            in_specs=[x_spec, w_spec, invw_spec, invx_spec, t_spec],
            out_specs=[o_spec, pl.BlockSpec((B, tn), lambda j: (0, j))]),
        compiler_params=compiler_params,
    )(x_c, w_t, inv_wn, inv_xn, target2d)
    if c_pad != C:
        output = output[:, :C]
        cosine = cosine[:, :C]
    return output, cosine


def _reference(x, weight, target, *, s=64.0, m=0.5, easy_margin=False,
               compute_dtype=jnp.float32):
    # Pure-JAX reference mirroring the PyTorch code. `compute_dtype` rounds the
    # inputs the same way the kernel's MXU/streaming path does (bf16 or f32).
    xr = x.astype(compute_dtype).astype(jnp.float32)
    wr = weight.astype(compute_dtype).astype(jnp.float32)
    x_n = xr / jnp.maximum(jnp.linalg.norm(xr, axis=-1, keepdims=True), 1e-12)
    w_n = wr / jnp.maximum(jnp.linalg.norm(wr, axis=-1, keepdims=True), 1e-12)
    cosine = jnp.clip(x_n @ w_n.T, -1.0, 1.0)
    sine = jnp.sqrt(jnp.maximum(1.0 - cosine ** 2, 0.0))
    cos_m, sin_m = math.cos(m), math.sin(m)
    th, mm = math.cos(math.pi - m), math.sin(math.pi - m) * m
    phi = cosine * cos_m - sine * sin_m
    phi = jnp.where(cosine > 0, phi, cosine) if easy_margin else \
          jnp.where(cosine > th, phi, cosine - mm)
    one_hot = jax.nn.one_hot(target, cosine.shape[1], dtype=jnp.float32)
    return (one_hot * phi + (1.0 - one_hot) * cosine) * s, cosine


if __name__ == "__main__":
    B, in_features, out_features = 8, 32, 512

    key = jax.random.PRNGKey(0)
    kx, kw, kt = jax.random.split(key, 3)

    # Deterministic param init: xavier_uniform_ on (out_features, in_features)
    bound = math.sqrt(6.0 / (in_features + out_features))
    weight = jax.random.uniform(kw, (out_features, in_features),
                                dtype=jnp.float32, minval=-bound, maxval=bound)
    x = jax.random.normal(kx, (B, in_features), dtype=jnp.float32)
    target = jax.random.randint(kt, (B,), 0, out_features, dtype=jnp.int32)

    ref_out, ref_cos = _reference(x, weight, target, s=64.0, m=0.5)

    # --- f32 path, forced 4-tile grid over C: tight check vs f32 reference ----
    out_f32, cos_f32 = arc_margin_forward(x, weight, target, s=64.0, m=0.5,
                                          easy_margin=False, mode='train',
                                          compute_dtype=jnp.float32,
                                          block_c=128)
    jax.block_until_ready(out_f32)
    assert jnp.allclose(cos_f32, ref_cos, atol=1e-4, rtol=1e-4)
    assert jnp.allclose(out_f32, ref_out, atol=1e-3, rtol=1e-3)

    # --- bf16 streaming path (production default tiling) ----------------------
    out_bf, cos_bf = arc_margin_forward(x, weight, target, s=64.0, m=0.5,
                                        easy_margin=False, mode='train',
                                        compute_dtype=jnp.bfloat16)
    jax.block_until_ready(out_bf)
    ref_out_bf, ref_cos_bf = _reference(x, weight, target, s=64.0, m=0.5,
                                        compute_dtype=jnp.bfloat16)
    assert jnp.allclose(cos_bf, ref_cos_bf, atol=2e-3, rtol=2e-3)
    assert jnp.allclose(out_bf, ref_out_bf, atol=1e-1, rtol=1e-2)

    # --- bf16 cosine writeback (reduced output traffic) ------------------------
    out_bc, cos_bc = arc_margin_forward(x, weight, target, s=64.0, m=0.5,
                                        mode='train',
                                        compute_dtype=jnp.float32,
                                        cosine_dtype=jnp.bfloat16,
                                        block_c=128)
    jax.block_until_ready(out_bc)
    assert jnp.allclose(cos_bc.astype(jnp.float32), ref_cos, atol=1e-2, rtol=1e-2)
    assert jnp.allclose(out_bc, ref_out, atol=1e-3, rtol=1e-3)

    # --- easy_margin branch -----------------------------------------------------
    out_em, _ = arc_margin_forward(x, weight, target, s=64.0, m=0.5,
                                   easy_margin=True, mode='train',
                                   compute_dtype=jnp.float32, block_c=128)
    jax.block_until_ready(out_em)
    ref_em, _ = _reference(x, weight, target, s=64.0, m=0.5, easy_margin=True)
    assert jnp.allclose(out_em, ref_em, atol=1e-3, rtol=1e-3)

    # --- C not a multiple of the tile: exercises zero-padded final tile --------
    C2 = 300
    weight2 = weight[:C2]
    target2 = jnp.clip(target, 0, C2 - 1)
    out_p, cos_p = arc_margin_forward(x, weight2, target2, s=64.0, m=0.5,
                                      mode='train',
                                      compute_dtype=jnp.float32, block_c=128)
    jax.block_until_ready(out_p)
    ref_out_p, ref_cos_p = _reference(x, weight2, target2, s=64.0, m=0.5)
    assert out_p.shape == (B, C2) and cos_p.shape == (B, C2)
    assert jnp.allclose(cos_p, ref_cos_p, atol=1e-4, rtol=1e-4)
    assert jnp.allclose(out_p, ref_out_p, atol=1e-3, rtol=1e-3)

    # --- test (inference) mode: single cosine output ---------------------------
    none_out, cos_test = arc_margin_forward(x, weight, None, mode='test',
                                            compute_dtype=jnp.float32,
                                            block_c=128)
    jax.block_until_ready(cos_test)
    assert none_out is None
    assert jnp.allclose(cos_test, ref_cos, atol=1e-4, rtol=1e-4)

    print("KERNEL_OK")
</pallas_src>

<mosaic_0001>
module attributes {stable_mosaic.version = 11 : i64} {
  func.func @_arc_margin_train_kernel(%arg0: i32, %arg1: memref<8x32xf32, #tpu.memory_space<vmem>>, %arg2: memref<32x128xf32, #tpu.memory_space<vmem>>, %arg3: memref<1x128xf32, #tpu.memory_space<vmem>>, %arg4: memref<8x1xf32, #tpu.memory_space<vmem>>, %arg5: memref<8x1xi32, #tpu.memory_space<vmem>>, %arg6: memref<8x128xf32, #tpu.memory_space<vmem>>, %arg7: memref<8x128xf32, #tpu.memory_space<vmem>>) attributes {dimension_semantics = [#tpu.dimension_semantics<parallel>], iteration_bounds = array<i64: 4>, scalar_prefetch = 0 : i64, scratch_operands = 0 : i64, tpu.core_type = #tpu.core_type<tc>, window_params = [{pipeline_mode = #tpu.pipeline_mode<synchronous>, transform_indices = @transform_0, window_bounds = array<i64: 8, 32>}, {transform_indices = @transform_1, window_bounds = array<i64: 32, 128>}, {transform_indices = @transform_2, window_bounds = array<i64: 1, 128>}, {pipeline_mode = #tpu.pipeline_mode<synchronous>, transform_indices = @transform_3, window_bounds = array<i64: 8, 1>}, {pipeline_mode = #tpu.pipeline_mode<synchronous>, transform_indices = @transform_4, window_bounds = array<i64: 8, 1>}, {transform_indices = @transform_5, window_bounds = array<i64: 8, 128>}, {transform_indices = @transform_6, window_bounds = array<i64: 8, 128>}]} {
    %c0 = arith.constant 0 : index
    %c0_0 = arith.constant 0 : index
    %0 = vector.load %arg1[%c0, %c0_0] : memref<8x32xf32, #tpu.memory_space<vmem>>, vector<8x32xf32>
    %c0_1 = arith.constant 0 : index
    %c0_2 = arith.constant 0 : index
    %1 = vector.load %arg2[%c0_1, %c0_2] : memref<32x128xf32, #tpu.memory_space<vmem>>, vector<32x128xf32>
    %cst = arith.constant dense<0.000000e+00> : vector<8x128xf32>
    %2 = tpu.matmul %0, %1, %cst {dimension_numbers = #tpu.dot_dimension_numbers<[1], [0], [0], [1], [0, 0, 1, 1], [], []>} : vector<8x32xf32>, vector<32x128xf32>, vector<8x128xf32> -> vector<8x128xf32>
    %c0_3 = arith.constant 0 : index
    %c0_4 = arith.constant 0 : index
    %3 = vector.load %arg4[%c0_3, %c0_4] : memref<8x1xf32, #tpu.memory_space<vmem>>, vector<8x1xf32>
    %4 = vector.broadcast %3 : vector<8x1xf32> to vector<8x128xf32>
    %5 = arith.mulf %2, %4 : vector<8x128xf32>
    %c0_5 = arith.constant 0 : index
    %c0_6 = arith.constant 0 : index
    %6 = vector.load %arg3[%c0_5, %c0_6] : memref<1x128xf32, #tpu.memory_space<vmem>>, vector<1x128xf32>
    %7 = vector.broadcast %6 : vector<1x128xf32> to vector<8x128xf32>
    %8 = arith.mulf %5, %7 : vector<8x128xf32>
    %cst_7 = arith.constant -1.000000e+00 : f32
    %cst_8 = arith.constant 1.000000e+00 : f32
    %9 = vector.broadcast %cst_7 : f32 to vector<8x128xf32>
    %10 = arith.maximumf %9, %8 : vector<8x128xf32>
    %11 = vector.broadcast %cst_8 : f32 to vector<8x128xf32>
    %12 = arith.minimumf %11, %10 : vector<8x128xf32>
    %c0_9 = arith.constant 0 : index
    %c0_10 = arith.constant 0 : index
    %13 = vector.load %arg7[%c0_9, %c0_10] : memref<8x128xf32, #tpu.memory_space<vmem>>, vector<8x128xf32>
    tpu.vector_store %arg7[%c0_9, %c0_10], %12 {strides = array<i32>} : memref<8x128xf32, #tpu.memory_space<vmem>>, vector<8x128xf32>,
    %14 = arith.mulf %12, %12 : vector<8x128xf32>
    %cst_11 = arith.constant 1.000000e+00 : f32
    %15 = vector.broadcast %cst_11 : f32 to vector<8x128xf32>
    %16 = arith.subf %15, %14 : vector<8x128xf32>
    %cst_12 = arith.constant 0.000000e+00 : f32
    %17 = vector.broadcast %cst_12 : f32 to vector<8x128xf32>
    %18 = arith.maximumf %16, %17 : vector<8x128xf32>
    %19 = math.sqrt %18 : vector<8x128xf32>
    %cst_13 = arith.constant 0.87758255 : f32
    %20 = vector.broadcast %cst_13 : f32 to vector<8x128xf32>
    %21 = arith.mulf %12, %20 : vector<8x128xf32>
    %cst_14 = arith.constant 0.47942555 : f32
    %22 = vector.broadcast %cst_14 : f32 to vector<8x128xf32>
    %23 = arith.mulf %19, %22 : vector<8x128xf32>
    %24 = arith.subf %21, %23 : vector<8x128xf32>
    %cst_15 = arith.constant -0.87758255 : f32
    %25 = vector.broadcast %cst_15 : f32 to vector<8x128xf32>
    %26 = arith.cmpf ogt, %12, %25 : vector<8x128xf32>
    %cst_16 = arith.constant 0.239712775 : f32
    %27 = vector.broadcast %cst_16 : f32 to vector<8x128xf32>
    %28 = arith.subf %12, %27 : vector<8x128xf32>
    %29 = arith.select %26, %24, %28 : vector<8x128xi1>, vector<8x128xf32>
    %30 = tpu.iota {dimensions = array<i32: 1>} : vector<8x128xi32>
    %c128_i32 = arith.constant 128 : i32
    %31 = arith.muli %arg0, %c128_i32 : i32
    %32 = vector.broadcast %31 : i32 to vector<8x128xi32>
    %33 = arith.addi %30, %32 : vector<8x128xi32>
    %c0_17 = arith.constant 0 : index
    %c0_18 = arith.constant 0 : index
    %34 = vector.load %arg5[%c0_17, %c0_18] : memref<8x1xi32, #tpu.memory_space<vmem>>, vector<8x1xi32>
    %35 = vector.broadcast %34 : vector<8x1xi32> to vector<8x128xi32>
    %36 = arith.cmpi eq, %33, %35 : vector<8x128xi32>
    %37 = arith.select %36, %29, %12 : vector<8x128xi1>, vector<8x128xf32>
    %cst_19 = arith.constant 6.400000e+01 : f32
    %38 = vector.broadcast %cst_19 : f32 to vector<8x128xf32>
    %39 = arith.mulf %37, %38 : vector<8x128xf32>
    %c0_20 = arith.constant 0 : index
    %c0_21 = arith.constant 0 : index
    %40 = vector.load %arg6[%c0_20, %c0_21] : memref<8x128xf32, #tpu.memory_space<vmem>>, vector<8x128xf32>
    tpu.vector_store %arg6[%c0_20, %c0_21], %39 {strides = array<i32>} : memref<8x128xf32, #tpu.memory_space<vmem>>, vector<8x128xf32>,
    return
  }
  func.func @transform_0(%arg0: i32) -> (i32, i32) {
    %c0_i32 = arith.constant 0 : i32
    %c0_i32_0 = arith.constant 0 : i32
    %c0_i32_1 = arith.constant 0 : i32
    return %c0_i32, %c0_i32_0 : i32, i32
  }
  func.func @transform_1(%arg0: i32) -> (i32, i32) {
    %c0_i32 = arith.constant 0 : i32
    %c0_i32_0 = arith.constant 0 : i32
    return %c0_i32, %arg0 : i32, i32
  }
  func.func @transform_2(%arg0: i32) -> (i32, i32) {
    %c0_i32 = arith.constant 0 : i32
    %c0_i32_0 = arith.constant 0 : i32
    return %c0_i32, %arg0 : i32, i32
  }
  func.func @transform_3(%arg0: i32) -> (i32, i32) {
    %c0_i32 = arith.constant 0 : i32
    %c0_i32_0 = arith.constant 0 : i32
    %c0_i32_1 = arith.constant 0 : i32
    return %c0_i32, %c0_i32_0 : i32, i32
  }
  func.func @transform_4(%arg0: i32) -> (i32, i32) {
    %c0_i32 = arith.constant 0 : i32
    %c0_i32_0 = arith.constant 0 : i32
    %c0_i32_1 = arith.constant 0 : i32
    return %c0_i32, %c0_i32_0 : i32, i32
  }
  func.func @transform_5(%arg0: i32) -> (i32, i32) {
    %c0_i32 = arith.constant 0 : i32
    %c0_i32_0 = arith.constant 0 : i32
    return %c0_i32, %arg0 : i32, i32
  }
  func.func @transform_6(%arg0: i32) -> (i32, i32) {
    %c0_i32 = arith.constant 0 : i32
    %c0_i32_0 = arith.constant 0 : i32
    return %c0_i32, %arg0 : i32, i32
  }
}

</mosaic_0001>

<bundles_post_ra>
// kernel: tpu_custom_call.1
= control target key start
LH: loop header
LB: loop body
LE: loop exit
PB: predicated region body
PF: predicated region fallthrough
CT: control target
= control target key end

     0   :  { %12 = vsyncpa [#allocation3], 0  ;;  %s1054_s0 = inlined_call_operand.vmem [shape: f32[8,32], index: 0, kind: input, shape index: {}]   ;;  %s1055_s1 = inlined_call_operand.hbm [shape: f32[32,512], index: 1, kind: input, shape index: {}]   ;;  %s1056_s2 = inlined_call_operand.vmem [shape: f32[1,512], index: 2, kind: input, shape index: {}]   ;;  %s1057_s3 = inlined_call_operand.vmem [shape: f32[8,1], index: 3, kind: input, shape index: {}]   ;;  %s1058_s4 = inlined_call_operand.vmem [shape: s32[8,1], index: 4, kind: input, shape index: {}]   ;;  %s1059_s5 = inlined_call_operand.hbm [shape: f32[8,512], index: 5, kind: output, shape index: {0}]   ;;  %s1060_s6 = inlined_call_operand.hbm [shape: f32[8,512], index: 6, kind: output, shape index: {1}]  }
   0x1   :  { %14 = vsyncpa [#allocation3 + $0x1], 0 }
   0x2   :  { %15 = vsyncpa [#allocation4], 0 }
   0x3   :  { %17 = vsyncpa [#allocation4 + $0x1], 0 }
   0x4   :  { %18 = vsyncpa [#allocation7], 0 }
   0x5   :  { %20 = vsyncpa [#allocation7 + $0x1], 0  ;;  %s841_s21 = smov 0   ;;  %s843_s22 = smov 0  }
   0x6   :  { %s845_s23 = smov 0   ;;  %s847_s24 = smov 0  }
   0x7 LB: > { %s862_s25 = sadd.s32 4294967295, %s794_s24   ;;  %s563_s26 = sadd.s32 4294967294, %s794_s24   ;;  %s794_s24 = sphi %s847_s24, %s1073_s24   ;;  %s790_s23 = sphi %s845_s23, %s1072_s23   ;;  %s786_s22 = sphi %s843_s22, %s1071_s22   ;;  %s782_s21 = sphi %s841_s21, %s1070_s21  }
   0x8   : > { %s866_s27 = sadd.s32 1, %s794_s24   ;;  %s54_s28 = sadd.s32 1, %s790_s23 }
   0x9   : > { %s51_s29 = ssub.s32 %s794_s24, %s866_s27  ;;  %p61_p0 = scmp.ne.s32.totalorder %s790_s23, %s786_s22 }
   0xa   : > { %p52_p1 = scmp.eq.s32.totalorder %s51_s29, 0  ;;  %p62_p2 = scmp.eq.s32.totalorder %s794_s24, 0 }
   0xb   : > { %p67_p3 = scmp.ne.s32.totalorder %s786_s22, %s782_s21  ;;  %p68_p4 = scmp.eq.s32.totalorder %s862_s25, 0 }
   0xc   : > { %s878_s30 = scalar_select %p52_p1, %s790_s23, %s54_s28  }
   0xd   : > { %p880_p5 = por %p62_p2, %p61_p0  ;;  %p884_p6 = por %p68_p4, %p67_p3 }
   0xe   : > { %p159_p7 = scmp.eq.s32.totalorder %s862_s25, 3  ;;  %p165_p8 = scmp.eq.s32.totalorder %s563_s26, 3 }
   0xf   : > { %p622_p9 = scmp.lt.s32.totalorder %s794_s24, 4  ;;  %s220_s11 = sand.u32 1, %s790_s23  }
  0x10   : > { %p890_p10 = por %p159_p7, %p61_p0  ;;  %p894_p11 = por %p165_p8, %p67_p3 }
  0x11   : > { %s567_s12 = sshll.u32 %s794_s24, 7  ;;  %s566_s13 = sshll.u32 %s220_s11, 5 }
  0x12   : > { %s1064_s9 = scalar_select %p890_p10, 1, 0 }
  0x13   : > { %s1065_s10 = scalar_select %p894_p11, 1, 0 }
  0x14   : > { %s903_s16 = scalar_lea.hbm %s1055_s1, %s567_s12  ;;  %s224_s17 = scalar_lea.vmem [#allocation2], %s566_s13 }
  0x15   : > { %s230_s18 = sshll.u32 %s224_s17, 4  ;;  %p907_p12 = pnand %p622_p9, %p880_p5  ;;  %s911_s18 = int_to_ptr.vmem [resolvable:$true] %s230_s18 }
  0x16   : > { %s914_s20 = scalar_lea.sflag [#allocation3], %s220_s11  ;;  %s666_s26 = scalar_lea.hbm %s903_s16, 512 }
  0x17   : > { %p667_p0 = scmp.ne.s32.totalorder %s903_s16, %s666_s26  ;;  %p668_p1 = pneg %p907_p12 }
  0x18   : > { %s671_s7 = scalar_lea.hbm %s1055_s1, 2048  ;;  %p672_p4 = scmp.lt.u32.totalorder %s903_s16, %s1055_s1 }
  0x19   : > { %p669_p2 = pnand %p668_p1, %p667_p0  ;;  %p673_p5 = scmp.lt.u32.totalorder %s671_s7, %s666_s26 }
  0x1a   : > { %p675_p8 = scmp.lt.u32.totalorder %s666_s26, %s903_s16 }
  0x1b   : > { %p670_p3 = pneg %p669_p2  ;;  %p674_p7 = por %p673_p5, %p672_p4 }
  0x1d   : > { %p676_p9 = por %p675_p8, %p674_p7 }
  0x1f   : > { %p677_p13 = pnand %p676_p9, %p670_p3 }
  0x21   : > { %680 = shalt.err (!%p677_p13)
}
  0x22   : > { %s681_s11 = scalar_lea.vmem %s911_s18, 512  ;;  %s796_s14 = smov [#allocation2]  }
  0x23   : > { %p682_p0 = scmp.ne.s32.totalorder %s911_s18, %s681_s11  ;;  %s686_s15 = sshll.u32 %s796_s14, 4  ;;  %s687_s15 = int_to_ptr.vmem [resolvable:$false] %s686_s15 }
  0x24   : > { %s688_s17 = scalar_lea.vmem %s687_s15, 1024  ;;  %p689_p10 = scmp.lt.s32.totalorder %s911_s18, %s687_s15 }
  0x25   : > { %p684_p2 = pnand %p682_p0, %p668_p1  ;;  %p690_p4 = scmp.lt.s32.totalorder %s688_s17, %s681_s11 }
  0x27   : > { %p685_p11 = pneg %p684_p2  ;;  %p691_p5 = por %p690_p4, %p689_p10 }
  0x29   : > { %p692_p7 = pnand %p691_p5, %p685_p11 }
  0x2b   : > { %695 = shalt.err (!%p692_p7)
}
  0x2c   : > { %s797_s26 = smov 512   ;;  %s798_s28 = smov 128  }
  0x2d   : > { %s799_s29 = smov 8   ;;  %p244_p13 = scmp.lt.s32.totalorder %s794_s24, 5 }
  0x2e   : > { %614 = dma.hbm_to_vmem [thread:$0]  (!%p907_p12), %s903_s16, 512, %s911_s18, %s914_s20, %s797_s26, %s798_s28, %s799_s29  }
  0x2f   : > { %p1067_p1 = scmp.ge.s32.totalorder %s794_s24, 1 }
  0x31   : > { %p245_p3 = pnand %p1067_p1, %p244_p13 }
  0x32   : > { %s946_s7 = sand.u32 (!%p245_p3), 1, %s786_s22  }
  0x33   : > { %248 = sbr.rel (%p245_p3) target bundleno = 342 (0x156), region = 40  ;;  %s569_s12 = sshll.u32 (!%p245_p3), %s946_s7, 5 }
  0x34   : > { %s251_s13 = scalar_lea.sflag (!%p245_p3), [#allocation3], %s946_s7  ;;  %s254_s11 = scalar_lea.vmem (!%p245_p3), [#allocation2], %s569_s12 }
  0x3a   : > { %769 = dma.done.wait (%p884_p6), %s251_s13, 512  }
  0x3b   : > { %771 = vsyncadd (%p884_p6), %s251_s13, 4294966784  ;;  %v800_v0 = vmov 0.0|0.0   ;;  %vm801_vm0 = vmmov 0   ;;  %v802_v1 = vmov 0.0   ;;  %v803_v2 = vmov 0   ;;  %v295_v3 = vld [vmem:[%s254_s11] sm:$0xff] }
  0x3c   : > { %599 = vmatprep.subr.bf16.mxu0 %v800_v0  ;;  %596 = vmatprep.mubr.msk.f32.mxu0 %vm801_vm0, %v802_v1  ;;  %v296_v4 = vld [vmem:[%s254_s11 + $0x8] sm:$0xff]  ;;  %v297_v5 = vld [vmem:[%s254_s11 + $0x10] sm:$0xff]  ;;  %v298_v7 = vld [vmem:[%s254_s11 + $0x18] sm:$0xff]  ;;  %vm299_vm1 = vcmask 261120   ;;  %p291_p6 = scmp.lt.s32.totalorder %s862_s25, 3  ;;  %s570_s29 = sshll.u32 %s946_s7, 3 }
  0x3d   : > { %663 = vset.pattern.permute.xlu0 %v803_v2  ;;  %v600_v6 = vpack.c.bf16 %v296_v4, %v295_v3  ;;  %v373_v8 = vld [vmem:[%s1057_s3] sm:$0xff]  ;;  %v603_v9 = vpack.c.bf16 %v298_v7, %v297_v5  ;;  %s290_s12 = scalar_lea.vmem [#allocation6], %s570_s29  ;;  %s972_s11 = sshll.u32 %s862_s25, 7 }
  0x3e   : > { %376 = vperm.xlu0 %663, %v373_v8   ;;  %v412_v10 = vld [vmem:[%s1058_s4] sm:$0xff]  ;;  %s292_s15 = scalar_select %p291_p6, %s862_s25, 3 }
  0x3f   : > { %601 = vmatpush3.bf16.msra.mxu0 %v600_v6  ;;  %v294_v11 = vld [vmem:[%s1054_s0] sm:$0xff]  ;;  %s452_s13 = sshll.u32 %s290_s12, 4  ;;  %s978_s8 = scalar_lea.hbm %s1060_s6, %s972_s11  ;;  %s980_s13 = int_to_ptr.vmem [resolvable:$true] %s452_s13 }
  0x40   : > { %602 = vmatprep.subr.bf16.mxu0 %v800_v0  ;;  %s293_s28 = scalar_lea.vmem %s1056_s2, %s292_s15  ;;  %s426_s19 = scalar_lea.sflag [#allocation7], %s946_s7 }
  0x41   : > { %v573_v14 = vld [vmem:[%s293_s28] ss:$0 sm:$0xff]  ;;  %s696_s20 = scalar_lea.vmem %s980_s13, 128  ;;  %p1068_p11 = scmp.ne.s32.totalorder %s1064_s9, 0 }
  0x42   : > { %414 = vperm.xlu0 %663, %v412_v10   ;;  %p697_p10 = scmp.ne.s32.totalorder %s980_s13, %s696_s20  ;;  %s804_s25 = smov [#allocation6]  }
  0x43   : > { %604 = vmatpush3.bf16.msra.mxu0 %v603_v9  ;;  %s700_s14 = sshll.u32 %s804_s25, 4  ;;  %s701_s14 = int_to_ptr.vmem [resolvable:$false] %s700_s14 }
  0x44   : > { %p698_p12 = pnand %p697_p10, %p1068_p11  ;;  %s702_s15 = scalar_lea.vmem %s701_s14, 256 }
  0x45   : > { %p703_p9 = scmp.lt.s32.totalorder %s980_s13, %s701_s14  ;;  %p704_p0 = scmp.lt.s32.totalorder %s702_s15, %s696_s20 }
  0x46   : > { %597 = vmatmul.mubr.msk.f32.vlgmr.msra.gmra.mrb[0].mxu0 %vm299_vm1, %v294_v11  ;;  %p699_p8 = pneg %p698_p12 }
  0x47   : > { %p705_p2 = por %p704_p0, %p703_p9 }
  0x49   : > { %p706_p4 = pnand %p705_p2, %p699_p8 }
  0xbd   : > { %v377_v12 = vpop.permute.xlu0 %376 }
 0x119   : > { %v369_v13 = vpop.f32.mrb[0].mxu0 }
 0x11a   : > { %v379_v15 = vmul.f32 %v377_v12, %v369_v13  ;;  %v598_v16 = vpop.f32.mrb[1].mxu0 }
 0x11c   : > { %v387_v17 = vmul.f32 %v573_v14, %v379_v15 }
 0x11e   : > { %v574_v18 = vclamps-f32 %v387_v17, 1.0 }
 0x120   : > { %v391_v19 = vmul.f32 %v574_v18, %v574_v18  ;;  %390 = vst [vmem:[%s290_s12] sm:$0xff] %v574_v18 }
 0x121   : > { %709 = shalt.err (!%p706_p4)
}
 0x122   : > { %s710_s17 = scalar_lea.hbm %s978_s8, 128  ;;  %s714_s12 = scalar_lea.hbm %s1060_s6, 512 }
 0x123   : > { %p711_p5 = scmp.ne.s32.totalorder %s978_s8, %s710_s17  ;;  %p715_p1 = scmp.lt.u32.totalorder %s978_s8, %s1060_s6 }
 0x124   : > { %p716_p3 = scmp.lt.u32.totalorder %s714_s12, %s710_s17  ;;  %p718_p10 = scmp.lt.u32.totalorder %s710_s17, %s978_s8 }
 0x125   : > { %p712_p7 = pnand %p711_p5, %p1068_p11 }
 0x126   : > { %p717_p6 = por %p716_p3, %p715_p1 }
 0x127   : > { %p713_p13 = pneg %p712_p7 }
 0x128   : > { %p719_p12 = por %p718_p10, %p717_p6 }
 0x12a   : > { %p720_p8 = pnand %p719_p12, %p713_p13 }
 0x12c   : > { %723 = shalt.err (!%p720_p8)
}
 0x12d   : > { %608 = dma.vmem_to_hbm [thread:$0]  (%p1068_p11), %s980_s13, 128, %s978_s8, %s426_s19   ;;  %v392_v20 = vsub.f32 1.0, %v391_v19  ;;  %v407_v22 = vlaneseq  ;;  %v410_v26 = vstv %s972_s11  ;;  %v401_v31 = vmul.f32 0.87758255, %v574_v18  ;;  %v415_v33 = vpop.permute.xlu0 %414 }
 0x12e   : > { %v575_v35 = vadd.f32 -0.23971277, %v574_v18  ;;  %vm404_vm4 = vcmp.gt.f32.partialorder %v574_v18, -0.87758255  ;;  %s283_s13 = scalar_lea.vmem [#allocation5], %s570_s29  ;;  %s1011_s25 = scalar_lea.hbm %s1059_s5, %s972_s11 }
 0x12f   : > { %v393_v21 = vmax.f32 %v392_v20, 0.0  ;;  %v408_v24 = vand.u32 127, %v407_v22  ;;  %s439_s8 = sshll.u32 %s283_s13, 4  ;;  %s421_s14 = scalar_lea.sflag [#allocation4], %s946_s7  ;;  %s1013_s8 = int_to_ptr.vmem [resolvable:$true] %s439_s8 }
 0x130   : > { %s724_s15 = scalar_lea.vmem %s1013_s8, 128  ;;  %s805_s29 = smov [#allocation5]  }
 0x131   : > { %664 = vrsqrt.f32 %v393_v21  ;;  %vm396_vm2 = vcmp.eq.f32.partialorder %v393_v21, inf  ;;  %v399_v27 = vand.u32 2147483648, %v393_v21  ;;  %vm398_vm3 = vcmp.eq.f32.partialorder %v393_v21, 0.0  ;;  %p725_p9 = scmp.ne.s32.totalorder %s1013_s8, %s724_s15  ;;  %s728_s17 = sshll.u32 %s805_s29, 4  ;;  %s729_s17 = int_to_ptr.vmem [resolvable:$false] %s728_s17 }
 0x132   : > { %v411_v30 = vadd.s32 %v410_v26, %v408_v24  ;;  %s730_s26 = scalar_lea.vmem %s729_s17, 256  ;;  %p731_p4 = scmp.lt.s32.totalorder %s1013_s8, %s729_s17 }
 0x133   : > { %p726_p0 = pnand %p725_p9, %p1068_p11  ;;  %p732_p5 = scmp.lt.s32.totalorder %s730_s26, %s724_s15 }
 0x134   : > { %vm416_vm5 = vcmp.eq.s32.totalorder %v411_v30, %v415_v33 }
 0x135   : > { %p727_p2 = pneg %p726_p0  ;;  %p733_p7 = por %p732_p5, %p731_p4 }
 0x137   : > { %p734_p13 = pnand %p733_p7, %p727_p2 }
 0x13b   : > { %v665_v23 = vpop.eup %664 }
 0x13c   : > { %v395_v25 = vmul.f32 %v665_v23, %v393_v21 }
 0x13e   : > { %v397_v28 = vsel %vm396_vm2, %v393_v21, %v395_v25 }
 0x13f   : > { %v400_v29 = vsel %vm398_vm3, %v399_v27, %v397_v28 }
 0x140   : > { %v402_v32 = vmul.f32 0.47942555, %v400_v29 }
 0x142   : > { %v403_v34 = vsub.f32 %v401_v31, %v402_v32 }
 0x144   : > { %v406_v36 = vsel %vm404_vm4, %v403_v34, %v575_v35 }
 0x145   : > { %v417_v37 = vsel %vm416_vm5, %v406_v36, %v574_v18 }
 0x146   : > { %v418_v38 = vmul.f32 64.0, %v417_v37 }
 0x148   : > { %419 = vst [vmem:[%s283_s13] sm:$0xff] %v418_v38 }
 0x149   : > { %737 = shalt.err (!%p734_p13)
}
 0x14a   : > { %s738_s7 = scalar_lea.hbm %s1011_s25, 128  ;;  %s742_s12 = scalar_lea.hbm %s1059_s5, 512 }
 0x14b   : > { %p739_p1 = scmp.ne.s32.totalorder %s1011_s25, %s738_s7  ;;  %p743_p10 = scmp.lt.u32.totalorder %s1011_s25, %s1059_s5 }
 0x14c   : > { %p744_p12 = scmp.lt.u32.totalorder %s742_s12, %s738_s7  ;;  %p746_p9 = scmp.lt.u32.totalorder %s738_s7, %s1011_s25 }
 0x14d   : > { %p740_p3 = pnand %p739_p1, %p1068_p11 }
 0x14e   : > { %p745_p8 = por %p744_p12, %p743_p10 }
 0x14f   : > { %p741_p6 = pneg %p740_p3 }
 0x150   : > { %p747_p0 = por %p746_p9, %p745_p8 }
 0x152   : > { %p748_p2 = pnand %p747_p0, %p741_p6 }
 0x154   : > { %751 = shalt.err (!%p748_p2)
}
 0x155   : > { %607 = dma.vmem_to_hbm [thread:$0]  (%p1068_p11), %s1013_s8, 128, %s1011_s25, %s421_s14  }
 0x156 PF: > { %p623_p4 = scmp.ge.s32.totalorder %s794_s24, 2  ;;  %s464_s13 = sand.u32 1, %s782_s21  }
 0x157   : > { %p1069_p5 = scmp.ne.s32.totalorder %s1065_s10, 0  ;;  %s465_s19 = scalar_lea.sflag [#allocation4], %s464_s13 }
 0x159   : > { %p616_p7 = pnand %p623_p4, %p1069_p5 }
 0x15b   : > { %773 = dma.done.wait (!%p616_p7), %s465_s19, 128  }
 0x15c   : > { %775 = vsyncadd (!%p616_p7), %s465_s19, 4294967168  ;;  %s474_s20 = scalar_lea.sflag [#allocation7], %s464_s13 }
 0x15d   : > { %777 = dma.done.wait (!%p616_p7), %s474_s20, 128  }
 0x15e   : > { %779 = vsyncadd (!%p616_p7), %s474_s20, 4294967168  ;;  %p23_p11 = scmp.ge.s32.totalorder %s866_s27, 6   ;;  %s1070_s21 = smov %s786_s22 }
 0x15f   : > { %s1071_s22 = smov %s790_s23  ;;  %s1072_s23 = smov %s878_s30 }
 0x160   : > { %s1073_s24 = smov %s866_s27  ;;  %25 = sbr.rel (!%p23_p11) target bundleno = 7 (0x7), region = 105 }
 0x167   :  { %479 = vsyncpa [#allocation3], 1 }
 0x168   :  { %481 = vsyncpa [#allocation3 + $0x1], 1 }
 0x169   :  { %482 = vsyncpa [#allocation4], 1 }
 0x16a   :  { %484 = vsyncpa [#allocation4 + $0x1], 1 }
 0x16b   :  { %485 = vsyncpa [#allocation7], 1 }
 0x16c   :  { %487 = vsyncpa [#allocation7 + $0x1], 1 }

</bundles_post_ra>
